<compile_context>
chip_gen: v7x
topology: tpu7x:2x2x1
jax: 0.10.0
libtpu: 0.0.40
codegen_flags: <defaults>
</compile_context>

<pallas_src>
import functools

import jax
import jax.numpy as jnp
from jax.experimental import pallas as pl
from jax.experimental.pallas import tpu as pltpu

LANE = 128
MM_DTYPE = jnp.bfloat16        # MXU operand dtype (accumulation stays f32)


def _round_up(x, m):
    return (x + m - 1) // m * m


# ------------------------------ configuration ------------------------------

def make_config():
    return dict(
        trimmed_exp_len=16,        # G
        expression_emb_dim=16,     # E
        tokenizer_type='gene_name',
        cell_size=True,
        cell_shape=True,
        rep_dim=32,                # neighborhood representation width R
        n_shape_features=4,        # S
    )


def make_params(key, config):
    G = config['trimmed_exp_len']
    E = config['expression_emb_dim']
    R = config['rep_dim']
    S = config['n_shape_features']
    final = R + (1 if config['cell_size'] else 0) + (S if config['cell_shape'] else 0)
    ks = jax.random.split(key, 4)
    std = 0.02
    return {
        'expr_w': jax.random.normal(ks[0], (G, E), jnp.float32) * std,
        'expr_b': jnp.zeros((G, E), jnp.float32),
        'enc_w': jax.random.normal(ks[1], (G * E, R), jnp.float32) * std,
        'enc_b': jnp.zeros((R,), jnp.float32),
        'dec_w': jax.random.normal(ks[2], (R, G * E), jnp.float32) * std,
        'dec_b': jnp.zeros((G * E,), jnp.float32),
        'sp_w': jax.random.normal(ks[3], (E, final), jnp.float32) * std,
        'sp_b': jnp.zeros((final,), jnp.float32),
    }


# ------------------ one-time algebraic weight preprocessing -----------------

def prepare_fused_params(params, config, n_neighbors, mm_dtype=MM_DTYPE):
    """Fold the linear expression embedding through both pooling ops and pad
    all MXU output dims to 128-lane slabs.  Exact algebraic rewrites (up to
    float reassociation); done once per parameter set, outside the kernel."""
    f32 = jnp.float32
    G = config['trimmed_exp_len']
    E = config['expression_emb_dim']
    R = config['rep_dim']
    S = config['n_shape_features']
    N = n_neighbors
    GE = G * E
    NG = N * G
    NGp = _round_up(NG, LANE)
    final = R + (1 if config['cell_size'] else 0) + (S if config['cell_shape'] else 0)
    PAD = _round_up(final + 1, LANE)          # +1 spare lane for the recon SSE

    expr_w = params['expr_w']                                   # [G, E]
    expr_b = params['expr_b']                                   # [G, E]

    # flat[b, g*E+e] = x[b,g]*w[g,e] + b[g,e]  ==  x @ W_expand + bias_flat
    w_expand = (jnp.eye(G, dtype=f32)[:, :, None]
                * expr_w[None, :, :]).reshape(G, GE)             # [G, GE]
    bias_flat = expr_b.reshape(1, GE)                            # [1, GE]

    # neighbor-mean pooling folded into the embedding:
    #   flat = mean_n(nexp) @ W_expand + bias  ==  nexp_flat @ W_pool + bias
    w_pool = jnp.zeros((NGp, GE), f32).at[:NG, :].set(
        jnp.tile(w_expand / N, (N, 1)))                          # [NGp, GE]

    # encoder / decoder padded so `rep` lives in a lane-dense [*, PAD] slab
    enc_w = jnp.zeros((GE, PAD), f32).at[:, :R].set(params['enc_w'])
    enc_b = jnp.zeros((1, PAD), f32).at[:, :R].set(params['enc_b'][None, :])
    dec_w = jnp.zeros((PAD, GE), f32).at[:R, :].set(params['dec_w'])
    dec_b = params['dec_b'][None, :]                             # [1, GE]

    # SpatialEmbedder('gene_name') folded through embedding + gene mean +
    # attention-weighted neighbor sum:
    #   spatial = (att_expand * nexp_flat) @ W_sp_flat + b_sp
    sp_comb_w = (expr_w / G) @ params['sp_w']                    # [G, final]
    sp_comb_b = jnp.mean(expr_b, axis=0) @ params['sp_w'] + params['sp_b']
    sp_w_flat = jnp.zeros((NGp, PAD), f32).at[:NG, :final].set(
        jnp.tile(sp_comb_w, (N, 1)))                             # [NGp, PAD]
    sp_b = jnp.zeros((1, PAD), f32).at[:, :final].set(sp_comb_b[None, :])

    # att expansion matrix: expand[n, n*G+g] = 1  (so att @ expand replicates
    # each attention weight across its neighbor's G lanes)
    rows = jax.lax.broadcasted_iota(jnp.int32, (N, NGp), 0)
    cols = jax.lax.broadcasted_iota(jnp.int32, (N, NGp), 1)
    expand = ((cols >= rows * G) & (cols < (rows + 1) * G)).astype(f32)

    fused = dict(
        w_expand=w_expand.astype(mm_dtype), bias_flat=bias_flat,
        w_pool=w_pool.astype(mm_dtype),
        enc_w=enc_w.astype(mm_dtype), enc_b=enc_b,
        dec_w=dec_w.astype(mm_dtype), dec_b=dec_b,
        sp_w_flat=sp_w_flat.astype(mm_dtype), sp_b=sp_b,
        expand=expand.astype(mm_dtype),
    )
    return fused, final, PAD, NGp


# --------------------------------- kernel -----------------------------------

def _fused_kernel(nexp_ref, expcc_ref, dist_ref, extras_ref,
                  w_expand_ref, bias_flat_ref, w_pool_ref,
                  enc_w_ref, enc_b_ref, dec_w_ref, dec_b_ref,
                  sp_w_ref, sp_b_ref, expand_ref,
                  slab_ref, cell_ref,
                  *, final_col, mm_dtype):
    f32 = jnp.float32
    mm = mm_dtype
    bias_flat = bias_flat_ref[...]                               # [1, GE]

    # --- center-cell expression embedding, lane-dense [TB, GE] --------------
    cell_ref[...] = (jnp.dot(expcc_ref[...].astype(mm), w_expand_ref[...],
                             preferred_element_type=f32) + bias_flat)

    # --- neighborhood branch (mean pooling folded into W_pool) --------------
    nexp = nexp_ref[...]                                         # [TB, NGp] f32
    nexp_mm = nexp.astype(mm)
    flat = (jnp.dot(nexp_mm, w_pool_ref[...],
                    preferred_element_type=f32) + bias_flat)     # [TB, GE]

    # NeighborhoodRepresentation: MLP auto-encoder (in_dim_mlp = G*E)
    rep = jnp.maximum(
        jnp.dot(flat.astype(mm), enc_w_ref[...], preferred_element_type=f32)
        + enc_b_ref[...], 0.0)                                   # [TB, PAD]
    recon = (jnp.dot(rep.astype(mm), dec_w_ref[...], preferred_element_type=f32)
             + dec_b_ref[...])                                   # [TB, GE]
    diff = recon - flat
    row_sse = jnp.sum(diff * diff, axis=1, keepdims=True)        # [TB, 1]

    # --- SpatialEmbedder('gene_name'): softmax(-dist) attention, folded -----
    logits = -dist_ref[...]                                      # [TB, N]
    logits = logits - jnp.max(logits, axis=-1, keepdims=True)
    att = jnp.exp(logits)
    att = att / jnp.sum(att, axis=-1, keepdims=True)             # [TB, N]
    att_exp = jnp.dot(att.astype(mm), expand_ref[...],
                      preferred_element_type=f32)                # [TB, NGp]
    spatial = (jnp.dot((att_exp * nexp).astype(mm), sp_w_ref[...],
                       preferred_element_type=f32) + sp_b_ref[...])  # [TB, PAD]

    # --- lane-dense 128-wide output slab -------------------------------------
    #   cols [0, final): concat([rep, size, shape]) + spatial   (extras_ref
    #                    carries size/shape in their lane-aligned columns)
    #   col  final     : per-row recon SSE (reduced & normalized outside)
    pad = spatial.shape[-1]
    sse_lane = (jax.lax.broadcasted_iota(jnp.int32, (1, pad), 1)
                == final_col).astype(f32)
    slab_ref[...] = rep + extras_ref[...] + spatial + row_sse * sse_lane


# ------------------------------ forward wrapper ------------------------------

def spatial_t_embedder_forward(params, config, neighbor_exp, exp_cc, dist,
                               cell_size, cell_shape, size, shape,
                               mm_dtype=MM_DTYPE):
    if config['tokenizer_type'] != 'gene_name':
        # TODO(synk): spatial_sentencepiece branch — reference internals unavailable.
        raise NotImplementedError("sentencepiece tokenizer branch not implemented")

    B, N, G = neighbor_exp.shape
    E = config['expression_emb_dim']
    R = config['rep_dim']
    S = config['n_shape_features']
    GE = G * E
    NG = N * G

    fused, final, PAD, NGp = prepare_fused_params(params, config, N, mm_dtype)

    # lane-dense neighbor expression slab [B, NGp]
    nexp_flat = neighbor_exp.reshape(B, NG)
    if NGp > NG:
        nexp_flat = jnp.pad(nexp_flat, ((0, 0), (0, NGp - NG)))

    # per-row "extras" slab: size at col R, shape at cols [R+1, R+1+S)
    # (layout plumbing in the wrapper so the kernel only does full-width adds)
    pieces = [jnp.zeros((B, R), jnp.float32)]
    col = R
    if config['cell_size']:
        # reference: cell_size = size.unsqueeze(-1) (passed-in cell_size shadowed)
        pieces.append(size[:, None].astype(jnp.float32))
        col += 1
    if config['cell_shape']:
        pieces.append(cell_shape.astype(jnp.float32))
        col += S
    pieces.append(jnp.zeros((B, PAD - col), jnp.float32))
    extras = jnp.concatenate(pieces, axis=-1)                    # [B, PAD]

    # batch tiling: TB up to 256 rows (a couple MB double-buffered VMEM,
    # well inside every chip's scoped budget); pad rows, slice off later.
    TB = min(256, _round_up(B, 8))
    B_pad = _round_up(B, TB)
    grid = B_pad // TB
    pad_rows = B_pad - B
    if pad_rows:
        nexp_flat = jnp.pad(nexp_flat, ((0, pad_rows), (0, 0)))
        exp_cc = jnp.pad(exp_cc, ((0, pad_rows), (0, 0)))
        dist = jnp.pad(dist, ((0, pad_rows), (0, 0)))
        extras = jnp.pad(extras, ((0, pad_rows), (0, 0)))

    row = lambda i: (i, 0)
    const = lambda i: (0, 0)
    in_specs = [
        pl.BlockSpec((TB, NGp), row),                    # nexp_flat
        pl.BlockSpec((TB, G), row),                      # exp_cc
        pl.BlockSpec((TB, N), row),                      # dist
        pl.BlockSpec((TB, PAD), row),                    # extras (size|shape slab)
        pl.BlockSpec((G, GE), const),                    # w_expand   (resident)
        pl.BlockSpec((1, GE), const),                    # bias_flat  (resident)
        pl.BlockSpec((NGp, GE), const),                  # w_pool     (resident)
        pl.BlockSpec((GE, PAD), const),                  # enc_w      (resident)
        pl.BlockSpec((1, PAD), const),                   # enc_b      (resident)
        pl.BlockSpec((PAD, GE), const),                  # dec_w      (resident)
        pl.BlockSpec((1, GE), const),                    # dec_b      (resident)
        pl.BlockSpec((NGp, PAD), const),                 # sp_w_flat  (resident)
        pl.BlockSpec((1, PAD), const),                   # sp_b       (resident)
        pl.BlockSpec((N, NGp), const),                   # att expand (resident)
    ]
    out_specs = (
        pl.BlockSpec((TB, PAD), row),                    # nb_rep slab (+ SSE lane)
        pl.BlockSpec((TB, GE), row),                     # cell embedding, flat
    )
    out_shape = (
        jax.ShapeDtypeStruct((B_pad, PAD), jnp.float32),
        jax.ShapeDtypeStruct((B_pad, GE), jnp.float32),
    )

    kernel = functools.partial(_fused_kernel, final_col=final, mm_dtype=mm_dtype)
    slab, cell_flat = pl.pallas_call(
        kernel,
        out_shape=out_shape,
        grid_spec=pltpu.PrefetchScalarGridSpec(
            num_scalar_prefetch=0,
            grid=(grid,),
            in_specs=in_specs,
            out_specs=out_specs,
        ),
        compiler_params=pltpu.CompilerParams(
            dimension_semantics=("parallel",),
        ),
    )(nexp_flat, exp_cc, dist, extras,
      fused['w_expand'], fused['bias_flat'], fused['w_pool'],
      fused['enc_w'], fused['enc_b'], fused['dec_w'], fused['dec_b'],
      fused['sp_w_flat'], fused['sp_b'], fused['expand'])

    neighborhood_rep_emb = slab[:B, :final]
    recon_loss = jnp.sum(slab[:B, final]) / float(B * GE)
    cell_emb = cell_flat[:B].reshape(B, G, E)
    return neighborhood_rep_emb, recon_loss, cell_emb


# -------------------------- pure-jnp reference (f32) -------------------------

def _reference_forward(params, config, neighbor_exp, exp_cc, dist,
                       cell_size, cell_shape, size, shape):
    """Naive f32 reference (materializes [B,N,G,E]) with the same assumed
    submodule semantics, used only for correctness validation."""
    w, b = params['expr_w'], params['expr_b']
    nb_emb = neighbor_exp[..., None] * w + b                 # [B,N,G,E]
    cell_emb = exp_cc[..., None] * w + b                     # [B,G,E]
    pooled = jnp.mean(nb_emb, axis=1)                        # [B,G,E]
    flat = pooled.reshape(pooled.shape[0], -1)
    rep = jax.nn.relu(flat @ params['enc_w'] + params['enc_b'])
    recon = rep @ params['dec_w'] + params['dec_b']
    recon_loss = jnp.mean((recon - flat) ** 2)
    out = rep
    if config['cell_size']:
        out = jnp.concatenate([out, size[:, None]], axis=-1)
    if config['cell_shape']:
        out = jnp.concatenate([out, cell_shape], axis=-1)
    att = jax.nn.softmax(-dist, axis=-1)
    sp_pooled = jnp.einsum('bn,bne->be', att, jnp.mean(nb_emb, axis=2))
    spatial = sp_pooled @ params['sp_w'] + params['sp_b']
    return out + spatial, recon_loss, cell_emb


if __name__ == "__main__":
    config = make_config()
    params = make_params(jax.random.PRNGKey(42), config)

    B, N = 2, 8
    G = config['trimmed_exp_len']
    S = config['n_shape_features']

    key = jax.random.PRNGKey(0)
    ks = jax.random.split(key, 6)
    neighbor_exp = jax.random.uniform(ks[0], (B, N, G), jnp.float32)
    exp_cc = jax.random.uniform(ks[1], (B, G), jnp.float32)
    dist = jax.random.uniform(ks[2], (B, N), jnp.float32) * 10.0
    cell_size_arg = jax.random.uniform(ks[3], (B, 1), jnp.float32)  # shadowed in fwd (matches reference)
    cell_shape = jax.random.uniform(ks[4], (B, S), jnp.float32)
    size = jax.random.uniform(ks[5], (B,), jnp.float32)
    shape_feat = cell_shape  # 'shape' arg unused in the gene_name branch

    fwd = jax.jit(lambda p, *xs: spatial_t_embedder_forward(p, config, *xs))
    outs = fwd(params, neighbor_exp, exp_cc, dist,
               cell_size_arg, cell_shape, size, shape_feat)
    outs = jax.tree_util.tree_map(jax.block_until_ready, outs)

    nb_rep, recon_loss, cell_emb = outs
    final = config['rep_dim'] + 1 + S
    assert nb_rep.shape == (B, final)
    assert recon_loss.shape == ()
    assert cell_emb.shape == (B, G, config['expression_emb_dim'])

    # correctness check against the naive f32 reference (bf16 MXU operands ->
    # loose-ish tolerances)
    ref_rep, ref_loss, ref_cell = _reference_forward(
        params, config, neighbor_exp, exp_cc, dist,
        cell_size_arg, cell_shape, size, shape_feat)
    assert jnp.allclose(nb_rep, ref_rep, rtol=5e-2, atol=2e-3), "nb_rep mismatch"
    assert jnp.allclose(recon_loss, ref_loss, rtol=5e-2, atol=1e-5), "recon_loss mismatch"
    assert jnp.allclose(cell_emb, ref_cell, rtol=5e-2, atol=2e-3), "cell_emb mismatch"

    print("KERNEL_OK")
</pallas_src>

<mosaic_0001>
module attributes {stable_mosaic.version = 11 : i64} {
  func.func @_fused_kernel(%arg0: i32, %arg1: memref<8x128xf32, #tpu.memory_space<vmem>>, %arg2: memref<8x16xf32, #tpu.memory_space<vmem>>, %arg3: memref<8x8xf32, #tpu.memory_space<vmem>>, %arg4: memref<8x128xf32, #tpu.memory_space<vmem>>, %arg5: memref<16x256xbf16, #tpu.memory_space<vmem>>, %arg6: memref<1x256xf32, #tpu.memory_space<vmem>>, %arg7: memref<128x256xbf16, #tpu.memory_space<vmem>>, %arg8: memref<256x128xbf16, #tpu.memory_space<vmem>>, %arg9: memref<1x128xf32, #tpu.memory_space<vmem>>, %arg10: memref<128x256xbf16, #tpu.memory_space<vmem>>, %arg11: memref<1x256xf32, #tpu.memory_space<vmem>>, %arg12: memref<128x128xbf16, #tpu.memory_space<vmem>>, %arg13: memref<1x128xf32, #tpu.memory_space<vmem>>, %arg14: memref<8x128xbf16, #tpu.memory_space<vmem>>, %arg15: memref<8x128xf32, #tpu.memory_space<vmem>>, %arg16: memref<8x256xf32, #tpu.memory_space<vmem>>) attributes {dimension_semantics = [#tpu.dimension_semantics<parallel>], iteration_bounds = array<i64: 1>, scalar_prefetch = 0 : i64, scratch_operands = 0 : i64, tpu.core_type = #tpu.core_type<tc>, window_params = [{transform_indices = @transform_0, window_bounds = array<i64: 8, 128>}, {transform_indices = @transform_1, window_bounds = array<i64: 8, 16>}, {transform_indices = @transform_2, window_bounds = array<i64: 8, 8>}, {transform_indices = @transform_3, window_bounds = array<i64: 8, 128>}, {pipeline_mode = #tpu.pipeline_mode<synchronous>, transform_indices = @transform_4, window_bounds = array<i64: 16, 256>}, {pipeline_mode = #tpu.pipeline_mode<synchronous>, transform_indices = @transform_5, window_bounds = array<i64: 1, 256>}, {pipeline_mode = #tpu.pipeline_mode<synchronous>, transform_indices = @transform_6, window_bounds = array<i64: 128, 256>}, {pipeline_mode = #tpu.pipeline_mode<synchronous>, transform_indices = @transform_7, window_bounds = array<i64: 256, 128>}, {pipeline_mode = #tpu.pipeline_mode<synchronous>, transform_indices = @transform_8, window_bounds = array<i64: 1, 128>}, {pipeline_mode = #tpu.pipeline_mode<synchronous>, transform_indices = @transform_9, window_bounds = array<i64: 128, 256>}, {pipeline_mode = #tpu.pipeline_mode<synchronous>, transform_indices = @transform_10, window_bounds = array<i64: 1, 256>}, {pipeline_mode = #tpu.pipeline_mode<synchronous>, transform_indices = @transform_11, window_bounds = array<i64: 128, 128>}, {pipeline_mode = #tpu.pipeline_mode<synchronous>, transform_indices = @transform_12, window_bounds = array<i64: 1, 128>}, {pipeline_mode = #tpu.pipeline_mode<synchronous>, transform_indices = @transform_13, window_bounds = array<i64: 8, 128>}, {transform_indices = @transform_14, window_bounds = array<i64: 8, 128>}, {transform_indices = @transform_15, window_bounds = array<i64: 8, 256>}]} {
    %c0 = arith.constant 0 : index
    %c0_0 = arith.constant 0 : index
    %0 = vector.load %arg6[%c0, %c0_0] : memref<1x256xf32, #tpu.memory_space<vmem>>, vector<1x256xf32>
    %c0_1 = arith.constant 0 : index
    %c0_2 = arith.constant 0 : index
    %1 = vector.load %arg2[%c0_1, %c0_2] : memref<8x16xf32, #tpu.memory_space<vmem>>, vector<8x16xf32>
    %2 = arith.truncf %1 : vector<8x16xf32> to vector<8x16xbf16>
    %c0_3 = arith.constant 0 : index
    %c0_4 = arith.constant 0 : index
    %3 = vector.load %arg5[%c0_3, %c0_4] : memref<16x256xbf16, #tpu.memory_space<vmem>>, vector<16x256xbf16>
    %cst = arith.constant dense<0.000000e+00> : vector<8x256xf32>
    %4 = tpu.matmul %2, %3, %cst {dimension_numbers = #tpu.dot_dimension_numbers<[1], [0], [0], [1], [0, 0, 1, 1], [], []>} : vector<8x16xbf16>, vector<16x256xbf16>, vector<8x256xf32> -> vector<8x256xf32>
    %5 = vector.broadcast %0 : vector<1x256xf32> to vector<8x256xf32>
    %6 = arith.addf %4, %5 : vector<8x256xf32>
    %c0_5 = arith.constant 0 : index
    %c0_6 = arith.constant 0 : index
    %7 = vector.load %arg16[%c0_5, %c0_6] : memref<8x256xf32, #tpu.memory_space<vmem>>, vector<8x256xf32>
    tpu.vector_store %arg16[%c0_5, %c0_6], %6 {strides = array<i32>} : memref<8x256xf32, #tpu.memory_space<vmem>>, vector<8x256xf32>,
    %c0_7 = arith.constant 0 : index
    %c0_8 = arith.constant 0 : index
    %8 = vector.load %arg1[%c0_7, %c0_8] : memref<8x128xf32, #tpu.memory_space<vmem>>, vector<8x128xf32>
    %9 = arith.truncf %8 : vector<8x128xf32> to vector<8x128xbf16>
    %c0_9 = arith.constant 0 : index
    %c0_10 = arith.constant 0 : index
    %10 = vector.load %arg7[%c0_9, %c0_10] : memref<128x256xbf16, #tpu.memory_space<vmem>>, vector<128x256xbf16>
    %cst_11 = arith.constant dense<0.000000e+00> : vector<8x256xf32>
    %11 = tpu.matmul %9, %10, %cst_11 {dimension_numbers = #tpu.dot_dimension_numbers<[1], [0], [0], [1], [0, 0, 1, 1], [], []>} : vector<8x128xbf16>, vector<128x256xbf16>, vector<8x256xf32> -> vector<8x256xf32>
    %12 = vector.broadcast %0 : vector<1x256xf32> to vector<8x256xf32>
    %13 = arith.addf %11, %12 : vector<8x256xf32>
    %14 = arith.truncf %13 : vector<8x256xf32> to vector<8x256xbf16>
    %c0_12 = arith.constant 0 : index
    %c0_13 = arith.constant 0 : index
    %15 = vector.load %arg8[%c0_12, %c0_13] : memref<256x128xbf16, #tpu.memory_space<vmem>>, vector<256x128xbf16>
    %cst_14 = arith.constant dense<0.000000e+00> : vector<8x128xf32>
    %16 = tpu.matmul %14, %15, %cst_14 {dimension_numbers = #tpu.dot_dimension_numbers<[1], [0], [0], [1], [0, 0, 1, 1], [], []>} : vector<8x256xbf16>, vector<256x128xbf16>, vector<8x128xf32> -> vector<8x128xf32>
    %c0_15 = arith.constant 0 : index
    %c0_16 = arith.constant 0 : index
    %17 = vector.load %arg9[%c0_15, %c0_16] : memref<1x128xf32, #tpu.memory_space<vmem>>, vector<1x128xf32>
    %18 = vector.broadcast %17 : vector<1x128xf32> to vector<8x128xf32>
    %19 = arith.addf %16, %18 : vector<8x128xf32>
    %cst_17 = arith.constant 0.000000e+00 : f32
    %20 = vector.broadcast %cst_17 : f32 to vector<8x128xf32>
    %21 = arith.maximumf %19, %20 : vector<8x128xf32>
    %22 = arith.truncf %21 : vector<8x128xf32> to vector<8x128xbf16>
    %c0_18 = arith.constant 0 : index
    %c0_19 = arith.constant 0 : index
    %23 = vector.load %arg10[%c0_18, %c0_19] : memref<128x256xbf16, #tpu.memory_space<vmem>>, vector<128x256xbf16>
    %cst_20 = arith.constant dense<0.000000e+00> : vector<8x256xf32>
    %24 = tpu.matmul %22, %23, %cst_20 {dimension_numbers = #tpu.dot_dimension_numbers<[1], [0], [0], [1], [0, 0, 1, 1], [], []>} : vector<8x128xbf16>, vector<128x256xbf16>, vector<8x256xf32> -> vector<8x256xf32>
    %c0_21 = arith.constant 0 : index
    %c0_22 = arith.constant 0 : index
    %25 = vector.load %arg11[%c0_21, %c0_22] : memref<1x256xf32, #tpu.memory_space<vmem>>, vector<1x256xf32>
    %26 = vector.broadcast %25 : vector<1x256xf32> to vector<8x256xf32>
    %27 = arith.addf %24, %26 : vector<8x256xf32>
    %28 = arith.subf %27, %13 : vector<8x256xf32>
    %29 = arith.mulf %28, %28 : vector<8x256xf32>
    %cst_23 = arith.constant dense<0.000000e+00> : vector<8xf32>
    %30 = vector.multi_reduction <add>, %29, %cst_23 [1] : vector<8x256xf32> to vector<8xf32>
    %31 = vector.shape_cast %30 : vector<8xf32> to vector<8x1xf32>
    %c0_24 = arith.constant 0 : index
    %c0_25 = arith.constant 0 : index
    %32 = vector.load %arg3[%c0_24, %c0_25] : memref<8x8xf32, #tpu.memory_space<vmem>>, vector<8x8xf32>
    %cst_26 = arith.constant 0.000000e+00 : f32
    %33 = vector.broadcast %cst_26 : f32 to vector<8x8xf32>
    %34 = arith.subf %33, %32 : vector<8x8xf32>
    %cst_27 = arith.constant dense<0xFF800000> : vector<8xf32>
    %35 = vector.multi_reduction <maximumf>, %34, %cst_27 [1] : vector<8x8xf32> to vector<8xf32>
    %36 = vector.shape_cast %35 : vector<8xf32> to vector<8x1xf32>
    %37 = vector.broadcast %36 : vector<8x1xf32> to vector<8x8xf32>
    %38 = arith.subf %34, %37 : vector<8x8xf32>
    %39 = math.exp %38 : vector<8x8xf32>
    %cst_28 = arith.constant dense<0.000000e+00> : vector<8xf32>
    %40 = vector.multi_reduction <add>, %39, %cst_28 [1] : vector<8x8xf32> to vector<8xf32>
    %41 = vector.shape_cast %40 : vector<8xf32> to vector<8x1xf32>
    %42 = vector.broadcast %41 : vector<8x1xf32> to vector<8x8xf32>
    %43 = arith.divf %39, %42 : vector<8x8xf32>
    %44 = arith.truncf %43 : vector<8x8xf32> to vector<8x8xbf16>
    %c0_29 = arith.constant 0 : index
    %c0_30 = arith.constant 0 : index
    %45 = vector.load %arg14[%c0_29, %c0_30] : memref<8x128xbf16, #tpu.memory_space<vmem>>, vector<8x128xbf16>
    %cst_31 = arith.constant dense<0.000000e+00> : vector<8x128xf32>
    %46 = tpu.matmul %44, %45, %cst_31 {dimension_numbers = #tpu.dot_dimension_numbers<[1], [0], [0], [1], [0, 0, 1, 1], [], []>} : vector<8x8xbf16>, vector<8x128xbf16>, vector<8x128xf32> -> vector<8x128xf32>
    %47 = arith.mulf %46, %8 : vector<8x128xf32>
    %48 = arith.truncf %47 : vector<8x128xf32> to vector<8x128xbf16>
    %c0_32 = arith.constant 0 : index
    %c0_33 = arith.constant 0 : index
    %49 = vector.load %arg12[%c0_32, %c0_33] : memref<128x128xbf16, #tpu.memory_space<vmem>>, vector<128x128xbf16>
    %cst_34 = arith.constant dense<0.000000e+00> : vector<8x128xf32>
    %50 = tpu.matmul %48, %49, %cst_34 {dimension_numbers = #tpu.dot_dimension_numbers<[1], [0], [0], [1], [0, 0, 1, 1], [], []>} : vector<8x128xbf16>, vector<128x128xbf16>, vector<8x128xf32> -> vector<8x128xf32>
    %c0_35 = arith.constant 0 : index
    %c0_36 = arith.constant 0 : index
    %51 = vector.load %arg13[%c0_35, %c0_36] : memref<1x128xf32, #tpu.memory_space<vmem>>, vector<1x128xf32>
    %52 = vector.broadcast %51 : vector<1x128xf32> to vector<8x128xf32>
    %53 = arith.addf %50, %52 : vector<8x128xf32>
    %54 = tpu.iota {dimensions = array<i32: 1>} : vector<1x128xi32>
    %c37_i32 = arith.constant 37 : i32
    %55 = vector.broadcast %c37_i32 : i32 to vector<1x128xi32>
    %56 = arith.cmpi eq, %54, %55 : vector<1x128xi32>
    %57 = arith.extui %56 : vector<1x128xi1> to vector<1x128xi32>
    %58 = arith.sitofp %57 : vector<1x128xi32> to vector<1x128xf32>
    %c0_37 = arith.constant 0 : index
    %c0_38 = arith.constant 0 : index
    %59 = vector.load %arg4[%c0_37, %c0_38] : memref<8x128xf32, #tpu.memory_space<vmem>>, vector<8x128xf32>
    %60 = arith.addf %21, %59 : vector<8x128xf32>
    %61 = arith.addf %60, %53 : vector<8x128xf32>
    %62 = vector.broadcast %31 : vector<8x1xf32> to vector<8x128xf32>
    %63 = vector.broadcast %58 : vector<1x128xf32> to vector<8x128xf32>
    %64 = arith.mulf %62, %63 : vector<8x128xf32>
    %65 = arith.addf %61, %64 : vector<8x128xf32>
    %c0_39 = arith.constant 0 : index
    %c0_40 = arith.constant 0 : index
    %66 = vector.load %arg15[%c0_39, %c0_40] : memref<8x128xf32, #tpu.memory_space<vmem>>, vector<8x128xf32>
    tpu.vector_store %arg15[%c0_39, %c0_40], %65 {strides = array<i32>} : memref<8x128xf32, #tpu.memory_space<vmem>>, vector<8x128xf32>,
    return
  }
  func.func @transform_0(%arg0: i32) -> (i32, i32) {
    %c0_i32 = arith.constant 0 : i32
    %c0_i32_0 = arith.constant 0 : i32
    return %arg0, %c0_i32 : i32, i32
  }
  func.func @transform_1(%arg0: i32) -> (i32, i32) {
    %c0_i32 = arith.constant 0 : i32
    %c0_i32_0 = arith.constant 0 : i32
    return %arg0, %c0_i32 : i32, i32
  }
  func.func @transform_2(%arg0: i32) -> (i32, i32) {
    %c0_i32 = arith.constant 0 : i32
    %c0_i32_0 = arith.constant 0 : i32
    return %arg0, %c0_i32 : i32, i32
  }
  func.func @transform_3(%arg0: i32) -> (i32, i32) {
    %c0_i32 = arith.constant 0 : i32
    %c0_i32_0 = arith.constant 0 : i32
    return %arg0, %c0_i32 : i32, i32
  }
  func.func @transform_4(%arg0: i32) -> (i32, i32) {
    %c0_i32 = arith.constant 0 : i32
    %c0_i32_0 = arith.constant 0 : i32
    %c0_i32_1 = arith.constant 0 : i32
    return %c0_i32, %c0_i32_0 : i32, i32
  }
  func.func @transform_5(%arg0: i32) -> (i32, i32) {
    %c0_i32 = arith.constant 0 : i32
    %c0_i32_0 = arith.constant 0 : i32
    %c0_i32_1 = arith.constant 0 : i32
    return %c0_i32, %c0_i32_0 : i32, i32
  }
  func.func @transform_6(%arg0: i32) -> (i32, i32) {
    %c0_i32 = arith.constant 0 : i32
    %c0_i32_0 = arith.constant 0 : i32
    %c0_i32_1 = arith.constant 0 : i32
    return %c0_i32, %c0_i32_0 : i32, i32
  }
  func.func @transform_7(%arg0: i32) -> (i32, i32) {
    %c0_i32 = arith.constant 0 : i32
    %c0_i32_0 = arith.constant 0 : i32
    %c0_i32_1 = arith.constant 0 : i32
    return %c0_i32, %c0_i32_0 : i32, i32
  }
  func.func @transform_8(%arg0: i32) -> (i32, i32) {
    %c0_i32 = arith.constant 0 : i32
    %c0_i32_0 = arith.constant 0 : i32
    %c0_i32_1 = arith.constant 0 : i32
    return %c0_i32, %c0_i32_0 : i32, i32
  }
  func.func @transform_9(%arg0: i32) -> (i32, i32) {
    %c0_i32 = arith.constant 0 : i32
    %c0_i32_0 = arith.constant 0 : i32
    %c0_i32_1 = arith.constant 0 : i32
    return %c0_i32, %c0_i32_0 : i32, i32
  }
  func.func @transform_10(%arg0: i32) -> (i32, i32) {
    %c0_i32 = arith.constant 0 : i32
    %c0_i32_0 = arith.constant 0 : i32
    %c0_i32_1 = arith.constant 0 : i32
    return %c0_i32, %c0_i32_0 : i32, i32
  }
  func.func @transform_11(%arg0: i32) -> (i32, i32) {
    %c0_i32 = arith.constant 0 : i32
    %c0_i32_0 = arith.constant 0 : i32
    %c0_i32_1 = arith.constant 0 : i32
    return %c0_i32, %c0_i32_0 : i32, i32
  }
  func.func @transform_12(%arg0: i32) -> (i32, i32) {
    %c0_i32 = arith.constant 0 : i32
    %c0_i32_0 = arith.constant 0 : i32
    %c0_i32_1 = arith.constant 0 : i32
    return %c0_i32, %c0_i32_0 : i32, i32
  }
  func.func @transform_13(%arg0: i32) -> (i32, i32) {
    %c0_i32 = arith.constant 0 : i32
    %c0_i32_0 = arith.constant 0 : i32
    %c0_i32_1 = arith.constant 0 : i32
    return %c0_i32, %c0_i32_0 : i32, i32
  }
  func.func @transform_14(%arg0: i32) -> (i32, i32) {
    %c0_i32 = arith.constant 0 : i32
    %c0_i32_0 = arith.constant 0 : i32
    return %arg0, %c0_i32 : i32, i32
  }
  func.func @transform_15(%arg0: i32) -> (i32, i32) {
    %c0_i32 = arith.constant 0 : i32
    %c0_i32_0 = arith.constant 0 : i32
    return %arg0, %c0_i32 : i32, i32
  }
}

</mosaic_0001>

<bundles_post_ra>
// kernel: _lambda_.1
= control target key start
LH: loop header
LB: loop body
LE: loop exit
PB: predicated region body
PF: predicated region fallthrough
CT: control target
= control target key end

     0   :  { %v996_v1 = vmov 0   ;;  %vm599_vm0 = vcmask 64512   ;;  %vm76_vm1 = vcmask 130048   ;;  %v997_v47 = vmov 0.0   ;;  %s1344_s4 = inlined_call_operand.vmem [shape: bf16[16,256], index: 4, kind: input, shape index: {}]   ;;  %s1345_s2 = inlined_call_operand.vmem [shape: f32[8,8], index: 2, kind: input, shape index: {}]   ;;  %s1346_s1 = inlined_call_operand.vmem [shape: f32[8,16], index: 1, kind: input, shape index: {}]   ;;  %s1347_s6 = inlined_call_operand.vmem [shape: bf16[128,256], index: 6, kind: input, shape index: {}]   ;;  %s1348_s0 = inlined_call_operand.vmem [shape: f32[8,128], index: 0, kind: input, shape index: {}]   ;;  %s1349_s7 = inlined_call_operand.vmem [shape: bf16[256,128], index: 7, kind: input, shape index: {}]   ;;  %s1350_s9 = inlined_call_operand.vmem [shape: bf16[128,256], index: 9, kind: input, shape index: {}]   ;;  %s1351_s5 = inlined_call_operand.vmem [shape: f32[1,256], index: 5, kind: input, shape index: {}]   ;;  %s1352_s15 = inlined_call_operand.vmem [shape: f32[8,256], index: 15, kind: output, shape index: {1}]   ;;  %s1353_s13 = inlined_call_operand.vmem [shape: bf16[8,128], index: 13, kind: input, shape index: {}]   ;;  %s1354_s11 = inlined_call_operand.vmem [shape: bf16[128,128], index: 11, kind: input, shape index: {}]   ;;  %s1355_s8 = inlined_call_operand.vmem [shape: f32[1,128], index: 8, kind: input, shape index: {}]   ;;  %s1356_s10 = inlined_call_operand.vmem [shape: f32[1,256], index: 10, kind: input, shape index: {}]   ;;  %s1357_s3 = inlined_call_operand.vmem [shape: f32[8,128], index: 3, kind: input, shape index: {}]   ;;  %s1358_s12 = inlined_call_operand.vmem [shape: f32[1,128], index: 12, kind: input, shape index: {}]   ;;  %s1359_s14 = inlined_call_operand.vmem [shape: f32[8,128], index: 14, kind: output, shape index: {0}]  }
   0x1   :  { %v917_v0 = vld [vmem:[%s1344_s4 + $0x4] ss:$8 sps:$4 sm:$0xff]   ;;  %112 = vmatprep.mubr.bf16.mxu1 %v996_v1  ;;  %v919_v2 = vld [vmem:[%s1344_s4] ss:$8 sps:$4 sm:$0xff]   ;;  %v925_v10 = vld [vmem:[%s1347_s6 + $0x14] ss:$8 sps:$4 sm:$0xff]   ;;  %v56_v54 = vlaneseq }
   0x2   :  { %v1088_v3 = vld [vmem:[%s1345_s2] sm:$0xff]  ;;  %80 = vmatprep.subr.bf16.mxu1 %v917_v0  ;;  %v923_v11 = vld [vmem:[%s1347_s6 + $0x10] ss:$8 sps:$4 sm:$0xff]   ;;  %v931_v14 = vld [vmem:[%s1347_s6 + $0x34] ss:$8 sps:$4 sm:$0xff]   ;;  %vm616_vm2 = vcmask 1043456  }
   0x3   :  { %v51_v4 = vld [vmem:[%s1346_s1] sm:$0xff]  ;;  %v598_v5 = vsub.f32 0.0, %v1088_v3  ;;  %81 = vmatpush1.bf16.msra.mxu1 %v919_v2  ;;  %v929_v15 = vld [vmem:[%s1347_s6 + $0x30] ss:$8 sps:$4 sm:$0xff]   ;;  %v937_v18 = vld [vmem:[%s1347_s6 + $0x54] ss:$8 sps:$4 sm:$0xff]  }
   0x4   :  { %v52_v6 = vpack.c.bf16 %v51_v4, %v51_v4  ;;  %v920_v7 = vld [vmem:[%s1347_s6] ss:$8 sps:$4 sm:$0xff]   ;;  %v922_v8 = vld [vmem:[%s1347_s6 + $0x4] ss:$8 sps:$4 sm:$0xff]   ;;  %v935_v19 = vld [vmem:[%s1347_s6 + $0x50] ss:$8 sps:$4 sm:$0xff]  }
   0x5   :  { %v600_v9 = vsel %vm599_vm0, %v598_v5, -inf  ;;  %221 = vmatprep.subr.bf16.mxu1 %v922_v8  ;;  %v928_v12 = vld [vmem:[%s1347_s6 + $0x24] ss:$8 sps:$4 sm:$0xff]   ;;  %v926_v13 = vld [vmem:[%s1347_s6 + $0x20] ss:$8 sps:$4 sm:$0xff]   ;;  %v948_v30 = vld [vmem:[%s1349_s7 + $0x50] sm:$0xff]  }
   0x6   :  { %601 = vmax.xlane.f32.xlu0 %v600_v9  ;;  %794 = vmatmul.mubr.msk.bf16.vlgmr.msra.gmra.mrb[0].mxu1 %vm76_vm1, %v52_v6  ;;  %v934_v16 = vld [vmem:[%s1347_s6 + $0x44] ss:$8 sps:$4 sm:$0xff]   ;;  %v932_v17 = vld [vmem:[%s1347_s6 + $0x40] ss:$8 sps:$4 sm:$0xff]   ;;  %v943_v22 = vld [vmem:[%s1347_s6 + $0x74] ss:$8 sps:$4 sm:$0xff]  }
   0x7   :  { %222 = vmatpush1.bf16.msra.mxu1 %v920_v7  ;;  %253 = vmatprep.mubr.bf16.mxu1 %v996_v1  ;;  %v940_v20 = vld [vmem:[%s1347_s6 + $0x64] ss:$8 sps:$4 sm:$0xff]   ;;  %v938_v21 = vld [vmem:[%s1347_s6 + $0x60] ss:$8 sps:$4 sm:$0xff]   ;;  %v941_v23 = vld [vmem:[%s1347_s6 + $0x70] ss:$8 sps:$4 sm:$0xff]  }
   0x8   :  { %223 = vmatprep.subr.bf16.mxu1 %v925_v10  ;;  %v1148_v24 = vld [vmem:[%s1348_s0] sm:$0xff]  ;;  %v946_v28 = vld [vmem:[%s1349_s7 + $0x48] sm:$0xff]   ;;  %v949_v31 = vld [vmem:[%s1349_s7 + $0x10] sm:$0xff]   ;;  %v1232_v57 = vshrl.u32 %v56_v54, 7  ;;  %vm998_vm3 = vmmov 0  }
   0x9   :  { %v124_v25 = vpack.c.bf16 %v1148_v24, %v1148_v24  ;;  %v944_v26 = vld [vmem:[%s1349_s7 + $0x40] sm:$0xff]   ;;  %v947_v29 = vld [vmem:[%s1349_s7 + $0x8] sm:$0xff]   ;;  %v950_v32 = vld [vmem:[%s1349_s7 + $0x58] sm:$0xff]  }
   0xa   :  { %v945_v27 = vld [vmem:[%s1349_s7] sm:$0xff]   ;;  %855 = vmatprep.subr.bf16.mxu0 %v944_v26  ;;  %v951_v33 = vld [vmem:[%s1349_s7 + $0x18] sm:$0xff]   ;;  %v954_v36 = vld [vmem:[%s1349_s7 + $0x68] sm:$0xff]   ;;  %v58_v60 = vsub.s32 0, %v1232_v57  ;;  %v62_v63 = vsub.s32 1, %v1232_v57 }
   0xb   :  { %224 = vmatpush1.bf16.msra.mxu1 %v923_v11  ;;  %856 = vmatpush3.bf16.msra.mxu0 %v945_v27  ;;  %v952_v34 = vld [vmem:[%s1349_s7 + $0x60] sm:$0xff]   ;;  %v955_v37 = vld [vmem:[%s1349_s7 + $0x28] sm:$0xff]   ;;  %v956_v38 = vld [vmem:[%s1349_s7 + $0x70] sm:$0xff]  }
   0xc   :  { %225 = vmatprep.subr.bf16.mxu1 %v928_v12  ;;  %857 = vmatprep.subr.bf16.mxu0 %v946_v28  ;;  %v953_v35 = vld [vmem:[%s1349_s7 + $0x20] sm:$0xff]   ;;  %v957_v39 = vld [vmem:[%s1349_s7 + $0x30] sm:$0xff]   ;;  %v958_v40 = vld [vmem:[%s1349_s7 + $0x78] sm:$0xff]  }
   0xd   :  { %v959_v41 = vld [vmem:[%s1349_s7 + $0x38] sm:$0xff]   ;;  %v960_v48 = vld [vmem:[%s1350_s9] ss:$8 sps:$4 sm:$0xff]   ;;  %v962_v49 = vld [vmem:[%s1350_s9 + $0x4] ss:$8 sps:$4 sm:$0xff]  }
   0xe   :  { %v965_v50 = vld [vmem:[%s1350_s9 + $0x14] ss:$8 sps:$4 sm:$0xff]   ;;  %v963_v51 = vld [vmem:[%s1350_s9 + $0x10] ss:$8 sps:$4 sm:$0xff]   ;;  %v968_v52 = vld [vmem:[%s1350_s9 + $0x24] ss:$8 sps:$4 sm:$0xff]  }
   0xf   :  { %226 = vmatpush1.bf16.msra.mxu1 %v926_v13  ;;  %858 = vmatpush3.bf16.msra.mxu0 %v947_v29  ;;  %v966_v53 = vld [vmem:[%s1350_s9 + $0x20] ss:$8 sps:$4 sm:$0xff]   ;;  %v971_v55 = vld [vmem:[%s1350_s9 + $0x34] ss:$8 sps:$4 sm:$0xff]   ;;  %v969_v56 = vld [vmem:[%s1350_s9 + $0x30] ss:$8 sps:$4 sm:$0xff]  }
  0x10   :  { %227 = vmatprep.subr.bf16.mxu1 %v931_v14  ;;  %859 = vmatprep.subr.bf16.mxu0 %v948_v30  ;;  %v974_v58 = vld [vmem:[%s1350_s9 + $0x44] ss:$8 sps:$4 sm:$0xff]   ;;  %v972_v59 = vld [vmem:[%s1350_s9 + $0x40] ss:$8 sps:$4 sm:$0xff]   ;;  %v977_v61 = vld [vmem:[%s1350_s9 + $0x54] ss:$8 sps:$4 sm:$0xff]  }
  0x11   :  { %v50_v62 = vld [vmem:[%s1351_s5] sm:$0x3]  ;;  %v975_v0 = vld [vmem:[%s1350_s9 + $0x50] ss:$8 sps:$4 sm:$0xff]   ;;  %v983_v26 = vld [vmem:[%s1350_s9 + $0x74] ss:$8 sps:$4 sm:$0xff]  }
  0x12   :  { %v63_v2 = vrot.slane %v50_v62, %v62_v63  ;;  %v612_v14 = vld [vmem:[%s1353_s13] sm:$0xf]  ;;  %v981_v27 = vld [vmem:[%s1350_s9 + $0x70] ss:$8 sps:$4 sm:$0xff]   ;;  %v985_v29 = vld [vmem:[%s1354_s11 + $0x8] sm:$0xff]  }
  0x13   :  { %228 = vmatpush1.bf16.msra.mxu1 %v929_v15  ;;  %860 = vmatpush3.bf16.msra.mxu0 %v949_v31  ;;  %v984_v28 = vld [vmem:[%s1354_s11] sm:$0xff]   ;;  %v986_v30 = vld [vmem:[%s1354_s11 + $0x10] sm:$0xff]   ;;  %v987_v31 = vld [vmem:[%s1354_s11 + $0x18] sm:$0xff]  }
  0x14   :  { %229 = vmatprep.subr.bf16.mxu1 %v934_v16  ;;  %861 = vmatprep.subr.bf16.mxu0 %v950_v32  ;;  %v988_v32 = vld [vmem:[%s1354_s11 + $0x20] sm:$0xff]  }
  0x15   :  { %v778_v57 = vld [vmem:[%s1357_s3] sm:$0xff] }
  0x17   :  { %230 = vmatpush1.bf16.msra.mxu1 %v932_v17  ;;  %862 = vmatpush3.bf16.msra.mxu0 %v951_v33  ;;  %v989_v33 = vld [vmem:[%s1354_s11 + $0x28] sm:$0xff]  }
  0x18   :  { %231 = vmatprep.subr.bf16.mxu1 %v937_v18  ;;  %863 = vmatprep.subr.bf16.mxu0 %v952_v34  ;;  %v618_v18 = vsel %vm616_vm2, %v612_v14, 0  ;;  %v990_v34 = vld [vmem:[%s1354_s11 + $0x30] sm:$0xff]  }
  0x1b   :  { %232 = vmatpush1.bf16.msra.mxu1 %v935_v19  ;;  %864 = vmatpush3.bf16.msra.mxu0 %v953_v35  ;;  %v991_v35 = vld [vmem:[%s1354_s11 + $0x38] sm:$0xff]  }
  0x1c   :  { %233 = vmatprep.subr.bf16.mxu1 %v940_v20  ;;  %865 = vmatprep.subr.bf16.mxu0 %v954_v36 }
  0x1f   :  { %234 = vmatpush1.bf16.msra.mxu1 %v938_v21  ;;  %866 = vmatpush3.bf16.msra.mxu0 %v955_v37  ;;  %v811_v37 = vld [vmem:[%s1355_s8] ss:$0 sm:$0xff] }
  0x20   :  { %235 = vmatprep.subr.bf16.mxu1 %v943_v22  ;;  %867 = vmatprep.subr.bf16.mxu0 %v956_v38 }
  0x23   :  { %236 = vmatpush1.bf16.msra.mxu1 %v941_v23  ;;  %868 = vmatpush3.bf16.msra.mxu0 %v957_v39  ;;  %v980_v23 = vld [vmem:[%s1350_s9 + $0x64] ss:$8 sps:$4 sm:$0xff]  }
  0x24   :  { %869 = vmatprep.subr.bf16.mxu0 %v958_v40  ;;  %549 = vmatprep.subr.bf16.mxu1 %v962_v49 }
  0x26   :  { %254 = vmatmul.mubr.bf16.vlgmr.msra.gmra.mrb[4].mxu1 %v124_v25  ;;  %v978_v25 = vld [vmem:[%s1350_s9 + $0x60] ss:$8 sps:$4 sm:$0xff]  }
  0x27   :  { %581 = vmatprep.mubr.bf16.mxu1 %v996_v1  ;;  %870 = vmatpush3.bf16.msra.mxu0 %v959_v41  ;;  %v59_v1 = vrot.slane %v50_v62, %v58_v60 }
  0x28   :  { %888 = vmatprep.subr.bf16.mxu0 %v997_v47  ;;  %550 = vmatpush1.bf16.msra.mxu1 %v960_v48 }
  0x29   :  { %551 = vmatprep.subr.bf16.mxu1 %v965_v50 }
  0x2c   :  { %552 = vmatpush1.bf16.msra.mxu1 %v963_v51 }
  0x2d   :  { %553 = vmatprep.subr.bf16.mxu1 %v968_v52  ;;  %v457_v52 = vld [vmem:[%s1356_s10] sm:$0x3] }
  0x30   :  { %554 = vmatpush1.bf16.msra.mxu1 %v966_v53  ;;  %v462_v53 = vrot.slane %v457_v52, %v58_v60  ;;  %v845_v60 = vld [vmem:[%s1358_s12] ss:$0 sm:$0xff] }
  0x31   :  { %555 = vmatprep.subr.bf16.mxu1 %v971_v55  ;;  %v466_v55 = vrot.slane %v457_v52, %v62_v63 }
  0x34   :  { %556 = vmatpush1.bf16.msra.mxu1 %v969_v56 }
  0x35   :  { %557 = vmatprep.subr.bf16.mxu1 %v974_v58 }
  0x38   :  { %558 = vmatpush1.bf16.msra.mxu1 %v972_v59 }
  0x39   :  { %559 = vmatprep.subr.bf16.mxu1 %v977_v61 }
  0x3c   :  { %560 = vmatpush1.bf16.msra.mxu1 %v975_v0 }
  0x3d   :  { %561 = vmatprep.subr.bf16.mxu1 %v980_v23 }
  0x40   :  { %562 = vmatpush1.bf16.msra.mxu1 %v978_v25 }
  0x41   :  { %563 = vmatprep.subr.bf16.mxu1 %v983_v26 }
  0x44   :  { %564 = vmatpush1.bf16.msra.mxu1 %v981_v27 }
  0x93   :  { %v602_v42 = vpop.xlane.xlu0 %601 }
  0x94   :  { %v603_v43 = vsub.f32 %v598_v5, %v602_v42 }
  0x96   :  { %v604_v44 = vmul.f32 1.442695, %v603_v43 }
  0x98   :  { %992 = vpow2.f32 %v604_v44 }
  0xa2   :  { %v1202_v45 = vpop.eup %992 }
  0xa3   :  { %v606_v46 = vsel %vm599_vm0, %v1202_v45, 0.0 }
  0xa4   :  { %607 = vadd.xlane.f32.xlu0 %v606_v46 }
  0xd9   :  { %v114_v3 = vpop.f32.mrb[0].mxu1 }
  0xda   :  { %v115_v4 = vadd.f32 %v114_v3, %v59_v1  ;;  %v116_v5 = vpop.f32.mrb[1].mxu1 }
  0xdb   :  { %v117_v6 = vadd.f32 %v116_v5, %v63_v2  ;;  %v118_v7 = vpop.f32.mrb[2].mxu1 }
  0xdc   :  { %121 = vst [vmem:[%s1352_s15] sm:$0xff] %v115_v4  ;;  %v119_v8 = vpop.f32.mrb[3].mxu1 }
  0xdd   :  { %122 = vst [vmem:[%s1352_s15 + $0x8] sm:$0xff] %v117_v6 }
  0xf9   :  { %v255_v9 = vpop.f32.mrb[4].mxu1 }
  0xfa   :  { %v1261_v10 = vadd.f32 %v255_v9, %v59_v1  ;;  %v257_v11 = vpop.f32.mrb[5].mxu1 }
  0xfb   :  { %v1263_v12 = vadd.f32 %v257_v11, %v63_v2  ;;  %v259_v13 = vpop.f32.mrb[6].mxu1  ;;  %v774_v11 = vand.u32 127, %v56_v54 }
  0xfc   :  { %v260_v15 = vpop.f32.mrb[7].mxu1  ;;  %v262_v17 = vpack.c.bf16 %v1261_v10, %v1261_v10 }
  0xfd   :  { %v263_v16 = vpack.c.bf16 %v1263_v12, %v1263_v12  ;;  %vm775_vm4 = vcmp.eq.s32.totalorder %v774_v11, 37 }
  0xff   :  { %431 = vmatprep.mubr.bf16.mxu0 %v263_v16 }
 0x100   :  { %432 = vmatmul.mubr.bf16.vlgmr.msra.gmra.mrb[0].mxu0 %v262_v17 }
 0x101   :  { %889 = vmatpush3.bf16.msra.mxu0 %v618_v18  ;;  %890 = vmatprep.mubr.msk.bf16.mxu0 %vm998_vm3, %v997_v47 }
 0x102   :  { %894 = vmatprep.subr.bf16.mxu0 %v997_v47 }
 0x131   :  { %v608_v19 = vpop.xlane.xlu0 %607 }
 0x132   :  { %994 = vrcp.f32 %v608_v19 }
 0x13c   :  { %v995_v20 = vpop.eup %994 }
 0x13d   :  { %v610_v21 = vmul.f32 %v995_v20, %v1202_v45 }
 0x13f   :  { %v611_v22 = vpack.c.bf16 %v610_v21, %v610_v21 }
 0x141   :  { %891 = vmatmul.mubr.msk.bf16.vlgmr.msra.gmra.mrb[4].mxu0 %vm599_vm0, %v611_v22 }
 0x142   :  { %910 = vmatprep.mubr.msk.bf16.mxu0 %vm998_vm3, %v997_v47  ;;  %895 = vmatpush3.bf16.msra.mxu0 %v984_v28 }
 0x143   :  { %896 = vmatprep.subr.bf16.mxu0 %v997_v47 }
 0x146   :  { %897 = vmatpush3.bf16.msra.mxu0 %v985_v29 }
 0x147   :  { %898 = vmatprep.subr.bf16.mxu0 %v997_v47 }
 0x14a   :  { %899 = vmatpush3.bf16.msra.mxu0 %v986_v30 }
 0x14b   :  { %900 = vmatprep.subr.bf16.mxu0 %v997_v47 }
 0x14e   :  { %901 = vmatpush3.bf16.msra.mxu0 %v987_v31 }
 0x14f   :  { %902 = vmatprep.subr.bf16.mxu0 %v997_v47 }
 0x152   :  { %903 = vmatpush3.bf16.msra.mxu0 %v988_v32 }
 0x153   :  { %904 = vmatprep.subr.bf16.mxu0 %v997_v47 }
 0x156   :  { %905 = vmatpush3.bf16.msra.mxu0 %v989_v33 }
 0x157   :  { %906 = vmatprep.subr.bf16.mxu0 %v997_v47 }
 0x15a   :  { %907 = vmatpush3.bf16.msra.mxu0 %v990_v34 }
 0x15b   :  { %908 = vmatprep.subr.bf16.mxu0 %v997_v47 }
 0x15e   :  { %909 = vmatpush3.bf16.msra.mxu0 %v991_v35 }
 0x1d3   :  { %v871_v36 = vpop.f32.mrb[0].mxu0 }
 0x1d4   :  { %v872_v38 = vpop.f32.mrb[1].mxu0 }
 0x1d5   :  { %v873_v39 = vadd.f32 %v872_v38, %v871_v36  ;;  %v874_v40 = vpop.f32.mrb[2].mxu0 }
 0x1d6   :  { %v875_v41 = vpop.f32.mrb[3].mxu0 }
 0x1d7   :  { %v434_v42 = vadd.f32 %v873_v39, %v811_v37 }
 0x1d9   :  { %v439_v43 = vmax.f32 %v434_v42, 0.0 }
 0x1db   :  { %v440_v44 = vpack.c.bf16 %v439_v43, %v439_v43  ;;  %v779_v6 = vadd.f32 %v778_v57, %v439_v43 }
 0x1dd   :  { %582 = vmatmul.mubr.bf16.vlgmr.msra.gmra.mrb[8].mxu1 %v440_v44 }
 0x214   :  { %v654_v45 = vpop.f32.mrb[4].mxu0 }
 0x215   :  { %v660_v46 = vmul.f32 %v654_v45, %v1148_v24  ;;  %v892_v48 = vpop.f32.mrb[5].mxu0 }
 0x216   :  { %v657_v49 = vpop.f32.mrb[6].mxu0 }
 0x217   :  { %v661_v50 = vpack.c.bf16 %v660_v46, %v660_v46  ;;  %v893_v51 = vpop.f32.mrb[7].mxu0 }
 0x219   :  { %911 = vmatmul.mubr.bf16.vlgmr.msra.gmra.mrb[8].mxu0 %v661_v50 }
 0x2b0   :  { %v583_v56 = vpop.f32.mrb[8].mxu1 }
 0x2b1   :  { %v584_v58 = vadd.f32 %v583_v56, %v462_v53  ;;  %v585_v59 = vpop.f32.mrb[9].mxu1 }
 0x2b2   :  { %v586_v61 = vadd.f32 %v585_v59, %v466_v55  ;;  %v587_v24 = vpop.f32.mrb[10].mxu1 }
 0x2b3   :  { %v588_v62 = vpop.f32.mrb[11].mxu1  ;;  %v590_v0 = vsub.f32 %v584_v58, %v1261_v10 }
 0x2b4   :  { %v591_v1 = vsub.f32 %v586_v61, %v1263_v12  ;;  %v854_v12 = vsel %vm775_vm4, 1.0, %v997_v47 }
 0x2b5   :  { %v592_v2 = vmul.f32 %v590_v0, %v590_v0 }
 0x2b6   :  { %v593_v3 = vmul.f32 %v591_v1, %v591_v1 }
 0x2b8   :  { %v594_v4 = vadd.f32 %v593_v3, %v592_v2 }
 0x2ba   :  { %595 = vadd.xlane.f32.xlu1 %v594_v4 }
 0x2ec   :  { %v767_v63 = vpop.f32.mrb[8].mxu0 }
 0x2ed   :  { %v768_v5 = vadd.f32 %v845_v60, %v767_v63  ;;  %v912_v7 = vpop.f32.mrb[9].mxu0 }
 0x2ee   :  { %v770_v8 = vpop.f32.mrb[10].mxu0 }
 0x2ef   :  { %v780_v9 = vadd.f32 %v779_v6, %v768_v5  ;;  %v913_v10 = vpop.f32.mrb[11].mxu0 }
 0x347   :  { %v596_v13 = vpop.xlane.xlu1 %595 }
 0x348   :  { %v781_v14 = vmul.f32 %v854_v12, %v596_v13 }
 0x34a   :  { %v782_v15 = vadd.f32 %v781_v14, %v780_v9 }
 0x34c   :  { %783 = vst [vmem:[%s1359_s14] sm:$0xff] %v782_v15 }

</bundles_post_ra>
